<compile_context>
chip_gen: v7x
topology: tpu7x:2x2x1
jax: 0.10.0
libtpu: 0.0.40
codegen_flags: <defaults>
</compile_context>

<pallas_src>
import math
import jax
import jax.numpy as jnp
from jax.experimental import pallas as pl
from jax.experimental.pallas import tpu as pltpu

# ----------------------------- model config ---------------------------------
B = 2          # batch
S = 8          # seq_len
D = 32         # d_model
H = 4          # heads
DK = D // H    # per-head dim
F = 64         # d_ff
LN_EPS = 1e-5  # torch.nn.LayerNorm default

# rows of the packed f32 vector slab ([16, 128]); each row padded to 128 lanes
_ROW_BQKV, _ROW_BO, _ROW_B1, _ROW_B2 = 0, 1, 2, 3
_ROW_G1, _ROW_BETA1, _ROW_G2, _ROW_BETA2 = 4, 5, 6, 7
_ROW_MASK = 8                 # rows 8 .. 8 + H*B - 1 : key-padding bias, tiled per head
_VEC_ROWS = 16

# 128-aligned column offsets inside the packed bf16 weight slab ([D, 384])
_COL_WQKV = 0                 # width 3*D
_COL_WO = 128                 # width D
_COL_W1 = 256                 # width F
_WSLAB_COLS = 384


# ---------------------- fused encoder-layer kernel ---------------------------
def encoder_layer_kernel(x_ref, wslab_ref, w2_ref, vec_ref, o_ref):
    scale = 1.0 / math.sqrt(DK)

    x_bf = x_ref[...]                                   # [B*S, D] bf16
    x_f32 = x_bf.astype(jnp.float32)

    wslab = wslab_ref[...]                              # [D, 384] bf16
    wqkv = wslab[:, _COL_WQKV:_COL_WQKV + 3 * D]        # [D, 3D]
    wo = wslab[:, _COL_WO:_COL_WO + D]                  # [D, D]
    w1 = wslab[:, _COL_W1:_COL_W1 + F]                  # [D, F]
    w2 = w2_ref[...]                                    # [F, D] bf16

    vec = vec_ref[...]                                  # [16, 128] f32
    b_qkv = vec[_ROW_BQKV:_ROW_BQKV + 1, 0:3 * D]       # [1, 3D]
    b_o = vec[_ROW_BO:_ROW_BO + 1, 0:D]
    b_1 = vec[_ROW_B1:_ROW_B1 + 1, 0:F]
    b_2 = vec[_ROW_B2:_ROW_B2 + 1, 0:D]
    g1 = vec[_ROW_G1:_ROW_G1 + 1, 0:D]
    beta1 = vec[_ROW_BETA1:_ROW_BETA1 + 1, 0:D]
    g2 = vec[_ROW_G2:_ROW_G2 + 1, 0:D]
    beta2 = vec[_ROW_BETA2:_ROW_BETA2 + 1, 0:D]
    key_bias = vec[_ROW_MASK:_ROW_MASK + H * B, 0:S]    # [H*B, S] (already tiled per head)

    # ---- fused QKV projection: one bf16 MXU matmul, f32 accumulate ----
    qkv = jnp.dot(x_bf, wqkv, preferred_element_type=jnp.float32) + b_qkv    # [B*S, 3D] f32

    # ---- fold all heads into one leading batch dim (index = h*B + b) ----
    q_hb = jnp.concatenate(
        [qkv[:, h * DK:(h + 1) * DK] for h in range(H)], axis=0).reshape(H * B, S, DK)
    k_hb = jnp.concatenate(
        [qkv[:, D + h * DK:D + (h + 1) * DK] for h in range(H)], axis=0).reshape(H * B, S, DK)
    v_hb = jnp.concatenate(
        [qkv[:, 2 * D + h * DK:2 * D + (h + 1) * DK] for h in range(H)], axis=0).reshape(H * B, S, DK)

    # ONE batched score einsum + ONE softmax over all heads + ONE batched P@V einsum
    s = jnp.einsum('bqd,bkd->bqk', q_hb, k_hb,
                   preferred_element_type=jnp.float32) * scale + key_bias[:, None, :]   # [H*B,S,S]
    m = jnp.max(s, axis=-1, keepdims=True)
    e = jnp.exp(s - m)
    p = e * pl.reciprocal(jnp.sum(e, axis=-1, keepdims=True), approx=True)
    o_hb = jnp.einsum('bqk,bkd->bqd', p, v_hb,
                      preferred_element_type=jnp.float32)                                # [H*B,S,DK]

    # head concat along features + ONE Wo matmul (heads back to column-major order)
    attn = jnp.concatenate([o_hb[h * B:(h + 1) * B] for h in range(H)], axis=-1)         # [B,S,D]
    attn = attn.reshape(B * S, D)
    z = jnp.dot(attn.astype(jnp.bfloat16), wo, preferred_element_type=jnp.float32) + b_o

    # TODO(synk): Dropout omitted (eval / inference mode -> identity).
    y = z + x_f32                                        # residual (f32)

    # LayerNorm_1 over last dim
    mu = jnp.mean(y, axis=-1, keepdims=True)
    var = jnp.mean((y - mu) ** 2, axis=-1, keepdims=True)
    y1 = (y - mu) * jax.lax.rsqrt(var + LN_EPS) * g1 + beta1

    # FFN (stays in VMEM / vregs; bf16 MXU inputs, f32 math)
    hdn = jnp.maximum(
        jnp.dot(y1.astype(jnp.bfloat16), w1, preferred_element_type=jnp.float32) + b_1, 0.0)
    y2 = jnp.dot(hdn.astype(jnp.bfloat16), w2, preferred_element_type=jnp.float32) + b_2 + y1

    # LayerNorm_2
    mu2 = jnp.mean(y2, axis=-1, keepdims=True)
    var2 = jnp.mean((y2 - mu2) ** 2, axis=-1, keepdims=True)
    out = (y2 - mu2) * jax.lax.rsqrt(var2 + LN_EPS) * g2 + beta2

    o_ref[...] = out.astype(o_ref.dtype)                 # [B*S, D]


# ------------------------------- wrapper -------------------------------------
def _pack_params(params, padding_mask):
    """Wrapper-side packing: bf16 [D,384] weight slab, bf16 W2, f32 [16,128] vector slab."""
    # guard the packing assumptions (see correctness review)
    assert 3 * D <= 128 and F <= 128 and S <= 128 and _ROW_MASK + H * B <= _VEC_ROWS

    def pad_cols(a, width):
        return jnp.pad(a, ((0, 0), (0, width - a.shape[1])))

    wqkv = jnp.concatenate([params["wq"], params["wk"], params["wv"]], axis=1)   # [D, 3D]
    wslab = jnp.concatenate(
        [pad_cols(wqkv, 128), pad_cols(params["wo"], 128), pad_cols(params["w1"], 128)],
        axis=1).astype(jnp.bfloat16)                                             # [D, 384]
    w2 = params["w2"].astype(jnp.bfloat16)                                       # [F, D]

    bqkv = jnp.concatenate([params["bq"], params["bk"], params["bv"]], axis=1)   # [1, 3D]
    key_bias = (1.0 - padding_mask.astype(jnp.float32)) * (-1e9)                 # [B, S]
    key_bias = jnp.tile(key_bias, (H, 1))                                        # [H*B, S]

    vec = jnp.concatenate([
        pad_cols(bqkv, 128), pad_cols(params["bo"], 128),
        pad_cols(params["b1"], 128), pad_cols(params["b2"], 128),
        pad_cols(params["ln1_g"], 128), pad_cols(params["ln1_b"], 128),
        pad_cols(params["ln2_g"], 128), pad_cols(params["ln2_b"], 128),
        pad_cols(key_bias, 128),
    ], axis=0)
    vec = jnp.pad(vec, ((0, _VEC_ROWS - vec.shape[0]), (0, 0)))                  # [16, 128]
    return wslab, w2, vec


@jax.jit
def encoder_layer(x, padding_mask, params):
    """x: [B, S, D] float32; padding_mask: [B, S] float32 (1 = valid, 0 = pad)."""
    B_, S_, D_ = x.shape
    wslab, w2, vec = _pack_params(params, padding_mask)
    x2 = x.reshape(B_ * S_, D_).astype(jnp.bfloat16)     # flat 2-D activation tile

    out2 = pl.pallas_call(
        encoder_layer_kernel,
        out_shape=jax.ShapeDtypeStruct((B_ * S_, D_), jnp.float32),
        grid=(1,),                                       # whole problem in a single grid step
        in_specs=[
            pl.BlockSpec((B_ * S_, D_), lambda i: (0, 0)),       # x (bf16)
            pl.BlockSpec((D_, _WSLAB_COLS), lambda i: (0, 0)),   # packed Wqkv|Wo|W1 (bf16)
            pl.BlockSpec((F, D_), lambda i: (0, 0)),             # W2 (bf16)
            pl.BlockSpec((_VEC_ROWS, 128), lambda i: (0, 0)),    # biases / LN / key-pad bias (f32)
        ],
        out_specs=pl.BlockSpec((B_ * S_, D_), lambda i: (0, 0)),
        compiler_params=pltpu.CompilerParams(dimension_semantics=("arbitrary",)),
    )(x2, wslab, w2, vec)
    return out2.reshape(B_, S_, D_)


# --------------------------- deterministic init ------------------------------
def make_params(key):
    ks = jax.random.split(key, 6)

    def lin(k, fan_in, fan_out):
        kw, kb = jax.random.split(k)
        bound = 1.0 / math.sqrt(fan_in)                   # nn.Linear default init bound
        w = jax.random.uniform(kw, (fan_in, fan_out), jnp.float32, -bound, bound)
        b = jax.random.uniform(kb, (1, fan_out), jnp.float32, -bound, bound)
        return w, b

    wq, bq = lin(ks[0], D, D)
    wk, bk = lin(ks[1], D, D)
    wv, bv = lin(ks[2], D, D)
    wo, bo = lin(ks[3], D, D)
    w1, b1 = lin(ks[4], D, F)
    w2, b2 = lin(ks[5], F, D)
    return dict(
        wq=wq, bq=bq, wk=wk, bk=bk, wv=wv, bv=bv, wo=wo, bo=bo,
        w1=w1, b1=b1, w2=w2, b2=b2,
        ln1_g=jnp.ones((1, D), jnp.float32), ln1_b=jnp.zeros((1, D), jnp.float32),
        ln2_g=jnp.ones((1, D), jnp.float32), ln2_b=jnp.zeros((1, D), jnp.float32),
    )


# --------------------------- pure-JAX reference ------------------------------
def encoder_layer_ref(x, padding_mask, p):
    B_, S_, D_ = x.shape
    dk = D_ // H

    def ln(v, g, b):
        mu = jnp.mean(v, -1, keepdims=True)
        var = jnp.mean((v - mu) ** 2, -1, keepdims=True)
        return (v - mu) / jnp.sqrt(var + LN_EPS) * g + b

    q = (x @ p["wq"] + p["bq"]).reshape(B_, S_, H, dk)
    k = (x @ p["wk"] + p["bk"]).reshape(B_, S_, H, dk)
    v = (x @ p["wv"] + p["bv"]).reshape(B_, S_, H, dk)
    scores = jnp.einsum('bqhd,bkhd->bhqk', q, k) / math.sqrt(dk)
    bias = (1.0 - padding_mask)[:, None, None, :] * (-1e9)
    probs = jax.nn.softmax(scores + bias, axis=-1)
    z = jnp.einsum('bhqk,bkhd->bqhd', probs, v).reshape(B_, S_, D_)
    z = z @ p["wo"] + p["bo"]
    y = ln(z + x, p["ln1_g"], p["ln1_b"])
    f = jnp.maximum(y @ p["w1"] + p["b1"], 0.0) @ p["w2"] + p["b2"]
    return ln(f + y, p["ln2_g"], p["ln2_b"])


if __name__ == "__main__":
    key = jax.random.PRNGKey(0)
    kx, kp = jax.random.split(key)
    x = jax.random.normal(kx, (B, S, D), jnp.float32)
    # last two positions of batch 1 are padding
    padding_mask = jnp.array(
        [[1.0] * S,
         [1.0] * (S - 2) + [0.0, 0.0]], dtype=jnp.float32)
    params = make_params(kp)

    out = jax.block_until_ready(encoder_layer(x, padding_mask, params))
    assert out.shape == (B, S, D)
    assert bool(jnp.all(jnp.isfinite(out)))

    # tolerance accounts for bf16 matmul operands + approx reciprocal in the kernel
    ref = encoder_layer_ref(x, padding_mask, params)
    assert bool(jnp.allclose(out, ref, atol=5e-2, rtol=5e-2)), float(jnp.max(jnp.abs(out - ref)))
    print("KERNEL_OK")
</pallas_src>

<mosaic_0001>
module attributes {stable_mosaic.version = 11 : i64} {
  func.func @encoder_layer_kernel(%arg0: i32, %arg1: memref<16x32xbf16, #tpu.memory_space<vmem>>, %arg2: memref<32x384xbf16, #tpu.memory_space<vmem>>, %arg3: memref<64x32xbf16, #tpu.memory_space<vmem>>, %arg4: memref<16x128xf32, #tpu.memory_space<vmem>>, %arg5: memref<16x32xf32, #tpu.memory_space<vmem>>) attributes {dimension_semantics = [#tpu.dimension_semantics<arbitrary>], iteration_bounds = array<i64: 1>, scalar_prefetch = 0 : i64, scratch_operands = 0 : i64, tpu.core_type = #tpu.core_type<tc>, window_params = [{pipeline_mode = #tpu.pipeline_mode<synchronous>, transform_indices = @transform_0, window_bounds = array<i64: 16, 32>}, {pipeline_mode = #tpu.pipeline_mode<synchronous>, transform_indices = @transform_1, window_bounds = array<i64: 32, 384>}, {pipeline_mode = #tpu.pipeline_mode<synchronous>, transform_indices = @transform_2, window_bounds = array<i64: 64, 32>}, {pipeline_mode = #tpu.pipeline_mode<synchronous>, transform_indices = @transform_3, window_bounds = array<i64: 16, 128>}, {pipeline_mode = #tpu.pipeline_mode<synchronous>, transform_indices = @transform_4, window_bounds = array<i64: 16, 32>}]} {
    %c0 = arith.constant 0 : index
    %c0_0 = arith.constant 0 : index
    %0 = vector.load %arg1[%c0, %c0_0] : memref<16x32xbf16, #tpu.memory_space<vmem>>, vector<16x32xbf16>
    %1 = arith.extf %0 : vector<16x32xbf16> to vector<16x32xf32>
    %c0_1 = arith.constant 0 : index
    %c0_2 = arith.constant 0 : index
    %2 = vector.load %arg2[%c0_1, %c0_2] : memref<32x384xbf16, #tpu.memory_space<vmem>>, vector<32x384xbf16>
    %3 = vector.extract_strided_slice %2 {offsets = [0, 0], sizes = [32, 96], strides = [1, 1]} : vector<32x384xbf16> to vector<32x96xbf16>
    %4 = vector.extract_strided_slice %2 {offsets = [0, 128], sizes = [32, 32], strides = [1, 1]} : vector<32x384xbf16> to vector<32x32xbf16>
    %5 = vector.extract_strided_slice %2 {offsets = [0, 256], sizes = [32, 64], strides = [1, 1]} : vector<32x384xbf16> to vector<32x64xbf16>
    %c0_3 = arith.constant 0 : index
    %c0_4 = arith.constant 0 : index
    %6 = vector.load %arg3[%c0_3, %c0_4] : memref<64x32xbf16, #tpu.memory_space<vmem>>, vector<64x32xbf16>
    %c0_5 = arith.constant 0 : index
    %c0_6 = arith.constant 0 : index
    %7 = vector.load %arg4[%c0_5, %c0_6] : memref<16x128xf32, #tpu.memory_space<vmem>>, vector<16x128xf32>
    %8 = vector.extract_strided_slice %7 {offsets = [0, 0], sizes = [1, 96], strides = [1, 1]} : vector<16x128xf32> to vector<1x96xf32>
    %9 = vector.extract_strided_slice %7 {offsets = [1, 0], sizes = [1, 32], strides = [1, 1]} : vector<16x128xf32> to vector<1x32xf32>
    %10 = vector.extract_strided_slice %7 {offsets = [2, 0], sizes = [1, 64], strides = [1, 1]} : vector<16x128xf32> to vector<1x64xf32>
    %11 = vector.extract_strided_slice %7 {offsets = [3, 0], sizes = [1, 32], strides = [1, 1]} : vector<16x128xf32> to vector<1x32xf32>
    %12 = vector.extract_strided_slice %7 {offsets = [4, 0], sizes = [1, 32], strides = [1, 1]} : vector<16x128xf32> to vector<1x32xf32>
    %13 = vector.extract_strided_slice %7 {offsets = [5, 0], sizes = [1, 32], strides = [1, 1]} : vector<16x128xf32> to vector<1x32xf32>
    %14 = vector.extract_strided_slice %7 {offsets = [6, 0], sizes = [1, 32], strides = [1, 1]} : vector<16x128xf32> to vector<1x32xf32>
    %15 = vector.extract_strided_slice %7 {offsets = [7, 0], sizes = [1, 32], strides = [1, 1]} : vector<16x128xf32> to vector<1x32xf32>
    %16 = vector.extract_strided_slice %7 {offsets = [8, 0], sizes = [8, 8], strides = [1, 1]} : vector<16x128xf32> to vector<8x8xf32>
    %cst = arith.constant dense<0.000000e+00> : vector<16x96xf32>
    %17 = tpu.matmul %0, %3, %cst {dimension_numbers = #tpu.dot_dimension_numbers<[1], [0], [0], [1], [0, 0, 1, 1], [], []>} : vector<16x32xbf16>, vector<32x96xbf16>, vector<16x96xf32> -> vector<16x96xf32>
    %18 = vector.broadcast %8 : vector<1x96xf32> to vector<16x96xf32>
    %19 = arith.addf %17, %18 : vector<16x96xf32>
    %20 = vector.extract_strided_slice %19 {offsets = [0, 0], sizes = [16, 8], strides = [1, 1]} : vector<16x96xf32> to vector<16x8xf32>
    %21 = vector.extract_strided_slice %19 {offsets = [0, 8], sizes = [16, 8], strides = [1, 1]} : vector<16x96xf32> to vector<16x8xf32>
    %22 = vector.extract_strided_slice %19 {offsets = [0, 16], sizes = [16, 8], strides = [1, 1]} : vector<16x96xf32> to vector<16x8xf32>
    %23 = vector.extract_strided_slice %19 {offsets = [0, 24], sizes = [16, 8], strides = [1, 1]} : vector<16x96xf32> to vector<16x8xf32>
    %24 = tpu.concatenate %20, %21, %22, %23 in 0 : vector<16x8xf32>, vector<16x8xf32>, vector<16x8xf32>, vector<16x8xf32> -> vector<64x8xf32>
    %25 = vector.shape_cast %24 : vector<64x8xf32> to vector<8x8x8xf32>
    %26 = vector.extract_strided_slice %19 {offsets = [0, 32], sizes = [16, 8], strides = [1, 1]} : vector<16x96xf32> to vector<16x8xf32>
    %27 = vector.extract_strided_slice %19 {offsets = [0, 40], sizes = [16, 8], strides = [1, 1]} : vector<16x96xf32> to vector<16x8xf32>
    %28 = vector.extract_strided_slice %19 {offsets = [0, 48], sizes = [16, 8], strides = [1, 1]} : vector<16x96xf32> to vector<16x8xf32>
    %29 = vector.extract_strided_slice %19 {offsets = [0, 56], sizes = [16, 8], strides = [1, 1]} : vector<16x96xf32> to vector<16x8xf32>
    %30 = tpu.concatenate %26, %27, %28, %29 in 0 : vector<16x8xf32>, vector<16x8xf32>, vector<16x8xf32>, vector<16x8xf32> -> vector<64x8xf32>
    %31 = vector.shape_cast %30 : vector<64x8xf32> to vector<8x8x8xf32>
    %32 = vector.extract_strided_slice %19 {offsets = [0, 64], sizes = [16, 8], strides = [1, 1]} : vector<16x96xf32> to vector<16x8xf32>
    %33 = vector.extract_strided_slice %19 {offsets = [0, 72], sizes = [16, 8], strides = [1, 1]} : vector<16x96xf32> to vector<16x8xf32>
    %34 = vector.extract_strided_slice %19 {offsets = [0, 80], sizes = [16, 8], strides = [1, 1]} : vector<16x96xf32> to vector<16x8xf32>
    %35 = vector.extract_strided_slice %19 {offsets = [0, 88], sizes = [16, 8], strides = [1, 1]} : vector<16x96xf32> to vector<16x8xf32>
    %36 = tpu.concatenate %32, %33, %34, %35 in 0 : vector<16x8xf32>, vector<16x8xf32>, vector<16x8xf32>, vector<16x8xf32> -> vector<64x8xf32>
    %37 = vector.shape_cast %36 : vector<64x8xf32> to vector<8x8x8xf32>
    "tpu.trace_start"() <{level = 10 : i32, message = "bqd,bkd->bqk"}> : () -> ()
    %cst_7 = arith.constant dense<0.000000e+00> : vector<8x8x8xf32>
    %38 = tpu.matmul %25, %31, %cst_7 {dimension_numbers = #tpu.dot_dimension_numbers<[2], [2], [1], [1], [0, 0, 0, 1, 1, 1], [0], [0]>} : vector<8x8x8xf32>, vector<8x8x8xf32>, vector<8x8x8xf32> -> vector<8x8x8xf32>
    "tpu.trace_stop"() : () -> ()
    %cst_8 = arith.constant 0.353553385 : f32
    %39 = vector.broadcast %cst_8 : f32 to vector<8x8x8xf32>
    %40 = arith.mulf %38, %39 : vector<8x8x8xf32>
    %41 = vector.shape_cast %16 : vector<8x8xf32> to vector<8x1x8xf32>
    %42 = vector.broadcast %41 : vector<8x1x8xf32> to vector<8x8x8xf32>
    %43 = arith.addf %40, %42 : vector<8x8x8xf32>
    %cst_9 = arith.constant dense<0xFF800000> : vector<8x8xf32>
    %44 = vector.multi_reduction <maximumf>, %43, %cst_9 [2] : vector<8x8x8xf32> to vector<8x8xf32>
    %45 = vector.shape_cast %44 : vector<8x8xf32> to vector<8x8x1xf32>
    %46 = vector.broadcast %45 : vector<8x8x1xf32> to vector<8x8x8xf32>
    %47 = arith.subf %43, %46 : vector<8x8x8xf32>
    %48 = math.exp %47 : vector<8x8x8xf32>
    %cst_10 = arith.constant dense<0.000000e+00> : vector<8x8xf32>
    %49 = vector.multi_reduction <add>, %48, %cst_10 [2] : vector<8x8x8xf32> to vector<8x8xf32>
    %50 = vector.shape_cast %49 : vector<8x8xf32> to vector<8x8x1xf32>
    %51 = tpu.reciprocal %50 {approx = true} : vector<8x8x1xf32> -> vector<8x8x1xf32>
    %52 = vector.broadcast %51 : vector<8x8x1xf32> to vector<8x8x8xf32>
    %53 = arith.mulf %48, %52 : vector<8x8x8xf32>
    "tpu.trace_start"() <{level = 10 : i32, message = "bqk,bkd->bqd"}> : () -> ()
    %cst_11 = arith.constant dense<0.000000e+00> : vector<8x8x8xf32>
    %54 = tpu.matmul %53, %37, %cst_11 {dimension_numbers = #tpu.dot_dimension_numbers<[2], [1], [1], [2], [0, 0, 0, 1, 1, 2], [0], [0]>} : vector<8x8x8xf32>, vector<8x8x8xf32>, vector<8x8x8xf32> -> vector<8x8x8xf32>
    "tpu.trace_stop"() : () -> ()
    %55 = vector.extract_strided_slice %54 {offsets = [0, 0, 0], sizes = [2, 8, 8], strides = [1, 1, 1]} : vector<8x8x8xf32> to vector<2x8x8xf32>
    %56 = vector.extract_strided_slice %54 {offsets = [2, 0, 0], sizes = [2, 8, 8], strides = [1, 1, 1]} : vector<8x8x8xf32> to vector<2x8x8xf32>
    %57 = vector.extract_strided_slice %54 {offsets = [4, 0, 0], sizes = [2, 8, 8], strides = [1, 1, 1]} : vector<8x8x8xf32> to vector<2x8x8xf32>
    %58 = vector.extract_strided_slice %54 {offsets = [6, 0, 0], sizes = [2, 8, 8], strides = [1, 1, 1]} : vector<8x8x8xf32> to vector<2x8x8xf32>
    %59 = tpu.concatenate %55, %56, %57, %58 in 2 : vector<2x8x8xf32>, vector<2x8x8xf32>, vector<2x8x8xf32>, vector<2x8x8xf32> -> vector<2x8x32xf32>
    %60 = vector.shape_cast %59 : vector<2x8x32xf32> to vector<16x32xf32>
    %61 = arith.truncf %60 : vector<16x32xf32> to vector<16x32xbf16>
    %cst_12 = arith.constant dense<0.000000e+00> : vector<16x32xf32>
    %62 = tpu.matmul %61, %4, %cst_12 {dimension_numbers = #tpu.dot_dimension_numbers<[1], [0], [0], [1], [0, 0, 1, 1], [], []>} : vector<16x32xbf16>, vector<32x32xbf16>, vector<16x32xf32> -> vector<16x32xf32>
    %63 = vector.broadcast %9 : vector<1x32xf32> to vector<16x32xf32>
    %64 = arith.addf %62, %63 : vector<16x32xf32>
    %65 = arith.addf %64, %1 : vector<16x32xf32>
    %cst_13 = arith.constant dense<0.000000e+00> : vector<16xf32>
    %66 = vector.multi_reduction <add>, %65, %cst_13 [1] : vector<16x32xf32> to vector<16xf32>
    %67 = vector.shape_cast %66 : vector<16xf32> to vector<16x1xf32>
    %cst_14 = arith.constant 3.200000e+01 : f32
    %68 = vector.broadcast %cst_14 : f32 to vector<16x1xf32>
    %69 = arith.divf %67, %68 : vector<16x1xf32>
    %70 = vector.broadcast %69 : vector<16x1xf32> to vector<16x32xf32>
    %71 = arith.subf %65, %70 : vector<16x32xf32>
    %72 = arith.mulf %71, %71 : vector<16x32xf32>
    %cst_15 = arith.constant dense<0.000000e+00> : vector<16xf32>
    %73 = vector.multi_reduction <add>, %72, %cst_15 [1] : vector<16x32xf32> to vector<16xf32>
    %74 = vector.shape_cast %73 : vector<16xf32> to vector<16x1xf32>
    %cst_16 = arith.constant 3.200000e+01 : f32
    %75 = vector.broadcast %cst_16 : f32 to vector<16x1xf32>
    %76 = arith.divf %74, %75 : vector<16x1xf32>
    %77 = vector.broadcast %69 : vector<16x1xf32> to vector<16x32xf32>
    %78 = arith.subf %65, %77 : vector<16x32xf32>
    %cst_17 = arith.constant 9.99999974E-6 : f32
    %79 = vector.broadcast %cst_17 : f32 to vector<16x1xf32>
    %80 = arith.addf %76, %79 : vector<16x1xf32>
    %81 = math.rsqrt %80 : vector<16x1xf32>
    %82 = vector.broadcast %81 : vector<16x1xf32> to vector<16x32xf32>
    %83 = arith.mulf %78, %82 : vector<16x32xf32>
    %84 = vector.broadcast %12 : vector<1x32xf32> to vector<16x32xf32>
    %85 = arith.mulf %83, %84 : vector<16x32xf32>
    %86 = vector.broadcast %13 : vector<1x32xf32> to vector<16x32xf32>
    %87 = arith.addf %85, %86 : vector<16x32xf32>
    %88 = arith.truncf %87 : vector<16x32xf32> to vector<16x32xbf16>
    %cst_18 = arith.constant dense<0.000000e+00> : vector<16x64xf32>
    %89 = tpu.matmul %88, %5, %cst_18 {dimension_numbers = #tpu.dot_dimension_numbers<[1], [0], [0], [1], [0, 0, 1, 1], [], []>} : vector<16x32xbf16>, vector<32x64xbf16>, vector<16x64xf32> -> vector<16x64xf32>
    %90 = vector.broadcast %10 : vector<1x64xf32> to vector<16x64xf32>
    %91 = arith.addf %89, %90 : vector<16x64xf32>
    %cst_19 = arith.constant 0.000000e+00 : f32
    %92 = vector.broadcast %cst_19 : f32 to vector<16x64xf32>
    %93 = arith.maximumf %91, %92 : vector<16x64xf32>
    %94 = arith.truncf %93 : vector<16x64xf32> to vector<16x64xbf16>
    %cst_20 = arith.constant dense<0.000000e+00> : vector<16x32xf32>
    %95 = tpu.matmul %94, %6, %cst_20 {dimension_numbers = #tpu.dot_dimension_numbers<[1], [0], [0], [1], [0, 0, 1, 1], [], []>} : vector<16x64xbf16>, vector<64x32xbf16>, vector<16x32xf32> -> vector<16x32xf32>
    %96 = vector.broadcast %11 : vector<1x32xf32> to vector<16x32xf32>
    %97 = arith.addf %95, %96 : vector<16x32xf32>
    %98 = arith.addf %97, %87 : vector<16x32xf32>
    %cst_21 = arith.constant dense<0.000000e+00> : vector<16xf32>
    %99 = vector.multi_reduction <add>, %98, %cst_21 [1] : vector<16x32xf32> to vector<16xf32>
    %100 = vector.shape_cast %99 : vector<16xf32> to vector<16x1xf32>
    %cst_22 = arith.constant 3.200000e+01 : f32
    %101 = vector.broadcast %cst_22 : f32 to vector<16x1xf32>
    %102 = arith.divf %100, %101 : vector<16x1xf32>
    %103 = vector.broadcast %102 : vector<16x1xf32> to vector<16x32xf32>
    %104 = arith.subf %98, %103 : vector<16x32xf32>
    %105 = arith.mulf %104, %104 : vector<16x32xf32>
    %cst_23 = arith.constant dense<0.000000e+00> : vector<16xf32>
    %106 = vector.multi_reduction <add>, %105, %cst_23 [1] : vector<16x32xf32> to vector<16xf32>
    %107 = vector.shape_cast %106 : vector<16xf32> to vector<16x1xf32>
    %cst_24 = arith.constant 3.200000e+01 : f32
    %108 = vector.broadcast %cst_24 : f32 to vector<16x1xf32>
    %109 = arith.divf %107, %108 : vector<16x1xf32>
    %110 = vector.broadcast %102 : vector<16x1xf32> to vector<16x32xf32>
    %111 = arith.subf %98, %110 : vector<16x32xf32>
    %cst_25 = arith.constant 9.99999974E-6 : f32
    %112 = vector.broadcast %cst_25 : f32 to vector<16x1xf32>
    %113 = arith.addf %109, %112 : vector<16x1xf32>
    %114 = math.rsqrt %113 : vector<16x1xf32>
    %115 = vector.broadcast %114 : vector<16x1xf32> to vector<16x32xf32>
    %116 = arith.mulf %111, %115 : vector<16x32xf32>
    %117 = vector.broadcast %14 : vector<1x32xf32> to vector<16x32xf32>
    %118 = arith.mulf %116, %117 : vector<16x32xf32>
    %119 = vector.broadcast %15 : vector<1x32xf32> to vector<16x32xf32>
    %120 = arith.addf %118, %119 : vector<16x32xf32>
    %c0_26 = arith.constant 0 : index
    %c0_27 = arith.constant 0 : index
    %121 = vector.load %arg5[%c0_26, %c0_27] : memref<16x32xf32, #tpu.memory_space<vmem>>, vector<16x32xf32>
    tpu.vector_store %arg5[%c0_26, %c0_27], %120 {strides = array<i32>} : memref<16x32xf32, #tpu.memory_space<vmem>>, vector<16x32xf32>,
    return
  }
  func.func @transform_0(%arg0: i32) -> (i32, i32) {
    %c0_i32 = arith.constant 0 : i32
    %c0_i32_0 = arith.constant 0 : i32
    %c0_i32_1 = arith.constant 0 : i32
    return %c0_i32, %c0_i32_0 : i32, i32
  }
  func.func @transform_1(%arg0: i32) -> (i32, i32) {
    %c0_i32 = arith.constant 0 : i32
    %c0_i32_0 = arith.constant 0 : i32
    %c0_i32_1 = arith.constant 0 : i32
    return %c0_i32, %c0_i32_0 : i32, i32
  }
  func.func @transform_2(%arg0: i32) -> (i32, i32) {
    %c0_i32 = arith.constant 0 : i32
    %c0_i32_0 = arith.constant 0 : i32
    %c0_i32_1 = arith.constant 0 : i32
    return %c0_i32, %c0_i32_0 : i32, i32
  }
  func.func @transform_3(%arg0: i32) -> (i32, i32) {
    %c0_i32 = arith.constant 0 : i32
    %c0_i32_0 = arith.constant 0 : i32
    %c0_i32_1 = arith.constant 0 : i32
    return %c0_i32, %c0_i32_0 : i32, i32
  }
  func.func @transform_4(%arg0: i32) -> (i32, i32) {
    %c0_i32 = arith.constant 0 : i32
    %c0_i32_0 = arith.constant 0 : i32
    %c0_i32_1 = arith.constant 0 : i32
    return %c0_i32, %c0_i32_0 : i32, i32
  }
}

</mosaic_0001>

<bundles_post_ra>
// kernel: encoder_layer.1
= control target key start
LH: loop header
LB: loop body
LE: loop exit
PB: predicated region body
PF: predicated region fallthrough
CT: control target
= control target key end

     0   :  { %v2165_v1 = vmov 0.0   ;;  %vm2166_vm0 = vmmov 0   ;;  %vm62_vm1 = vcmask 261120   ;;  %s2492_s0 = inlined_call_operand.vmem [shape: bf16[16,32], index: 0, kind: input, shape index: {}]   ;;  %s2493_s1 = inlined_call_operand.vmem [shape: bf16[32,384], index: 1, kind: input, shape index: {}]   ;;  %s2494_s2 = inlined_call_operand.vmem [shape: bf16[64,32], index: 2, kind: input, shape index: {}]   ;;  %s2495_s3 = inlined_call_operand.vmem [shape: f32[16,128], index: 3, kind: input, shape index: {}]   ;;  %s2496_s4 = inlined_call_operand.hbm [shape: f32[16,32], index: 4, kind: output, shape index: {}]  }
   0x1   :  { %v2086_v0 = vld [vmem:[%s2493_s1] ss:$12 sps:$4 sm:$0xff]   ;;  %1942 = vmatprep.subr.bf16.mxu0 %v2165_v1  ;;  %1946 = vmatprep.mubr.msk.bf16.mxu0 %vm2166_vm0, %v2165_v1  ;;  %v2089_v2 = vld [vmem:[%s2493_s1 + $0x18] ss:$12 sps:$4 sm:$0xff]  }
   0x2   :  { %1943 = vmatpush3.bf16.msra.mxu0 %v2086_v0  ;;  %v2215_v3 = vld [vmem:[%s2492_s0] sm:$0xff]   ;;  %1955 = vmatprep.subr.mxu1 %v2165_v1 }
   0x3   :  { %1944 = vmatprep.subr.bf16.mxu0 %v2165_v1  ;;  %1957 = vmatprep.mubr.msk.f32.mxu1 %vm2166_vm0, %v2165_v1 }
   0x6   :  { %1945 = vmatpush3.bf16.msra.mxu0 %v2089_v2 }
   0x7   :  { %1950 = vmatprep.subr.mxu0 %v2165_v1 }
   0x8   :  { %9 = vsyncpa [#allocation3], 0  ;;  %v41_v4 = vlaneseq  ;;  %v2234_v7 = vld [vmem:[%s2495_s3] sm:$0xff]  ;;  %s2167_s22 = smov 112   ;;  %s2168_s23 = smov 120   ;;  %vm123_vm2 = vcmask 64512  }
   0x9   :  { %1947 = vmatmul.mubr.msk.bf16.vlgmr.msra.gmra.mrb[0].mxu0 %vm62_vm1, %v2215_v3  ;;  %s2169_s24 = smov 104   ;;  %s2170_s25 = smov 96   ;;  %v2171_v29 = vmov 1966171168   ;;  %v40_v33 = vld [vmem:[%s2495_s3 + $0x8] sm:$0xff]  ;;  %vm1558_vm3 = vcmask 130048  }
   0xa   :  { %1952 = vmatprep.mubr.msk.f32.mxu0 %vm2166_vm0, %v2165_v1  ;;  %v2226_v5 = vshrl.u32 %v41_v4, 7  ;;  %v741_v30 = vunpack.c.l.s4 %v2171_v29  ;;  %v739_v50 = vcombine.high %v40_v33, %v40_v33  ;;  %s2172_s3 = smov 64   ;;  %s2173_s6 = smov 8   ;;  %vm1561_vm4 = vcmask 195584  }
   0xb   :  { %s2174_s7 = smov 16   ;;  %s2175_s8 = smov 24   ;;  %vm1754_vm5 = vcmask 523264  }
   0xc   :  { %v2229_v6 = vsub.s32 0, %v2226_v5  ;;  %v742_v31 = vunpack.c.0.s8 %v741_v30 }
   0xe   :  { %v44_v8 = vrot.slane %v2234_v7, %v2229_v6  ;;  %v745_v32 = vsub.s32 %v742_v31, %v2226_v5 }
  0x10   :  { %v746_v34 = vrot.slane %v40_v33, %v745_v32  ;;  %v753_v52 = vrot.slane %v739_v50, %v745_v32 }
  0x12   :  { %v754_v35 = vcombine.high %v746_v34, %v746_v34  ;;  %v762_v37 = vrot.slane %v746_v34, %v745_v32  ;;  %v769_v54 = vrot.slane %v753_v52, %v745_v32  ;;  %v755_v56 = vcombine.high %v753_v52, %v753_v52 }
  0x14   :  { %v776_v36 = vrot.slane %v754_v35, %v745_v32  ;;  %v791_v40 = vrot.slane %v762_v37, %v2229_v6  ;;  %v784_v51 = vcombine.high %v762_v37, %v762_v37  ;;  %v785_v60 = vcombine.high %v769_v54, %v769_v54 }
  0x15   :  { %v807_v62 = vrot.slane %v769_v54, %v2229_v6  ;;  %v783_v0 = vrot.slane %v755_v56, %v745_v32 }
  0x16   :  { %v795_v38 = vrot.slane %v776_v36, %v2229_v6  ;;  %v799_v53 = vrot.slane %v784_v51, %v2229_v6  ;;  %v786_v55 = vcombine.high %v776_v36, %v776_v36 }
  0x18   :  { %v803_v63 = vrot.slane %v786_v55, %v2229_v6 }
  0xdc   :  { %v100_v9 = vpop.f32.mrb[0].mxu0 }
  0xdd   :  { %v2238_v10 = vadd.f32 %v100_v9, %v44_v8  ;;  %v1948_v11 = vpop.f32.mrb[1].mxu0 }
  0xde   :  { %v103_v12 = vpop.f32.mrb[2].mxu0 }
  0xdf   :  { %113 = vrot.lane.b32.xlu1 %v2238_v10, %s2167_s22  ;;  %109 = vrot.lane.b32.xlu0 %v2238_v10, %s2168_s23  ;;  %v1949_v13 = vpop.f32.mrb[3].mxu0  ;;  %v2242_v14 = vadd.f32 %v103_v12, %v44_v8 }
  0xe3   :  { %115 = vrot.lane.b32.xlu1 %v2242_v14, %s2167_s22  ;;  %111 = vrot.lane.b32.xlu0 %v2242_v14, %s2168_s23 }
  0xe7   :  { %119 = vrot.lane.b32.xlu1 %v2242_v14, %s2169_s24  ;;  %117 = vrot.lane.b32.xlu0 %v2238_v10, %s2169_s24 }
  0xeb   :  { %198 = vrot.lane.b32.xlu1 %v2242_v14, %s2170_s25  ;;  %121 = vrot.lane.b32.xlu0 %v2238_v10, %s2170_s25 }
 0x151   :  { %v2250_v15 = vpop.permute.xlu1 %113  ;;  %v2252_v16 = vpop.permute.xlu0 %109 }
 0x152   :  { %274 = vrot.lane.b32.xlu0 %v2252_v16, %s2170_s25 }
 0x155   :  { %v2255_v17 = vpop.permute.xlu1 %115  ;;  %v2257_v18 = vpop.permute.xlu0 %111 }
 0x156   :  { %426 = vrot.lane.b32.xlu0 %v2250_v15, %s2170_s25  ;;  %350 = vrot.lane.b32.xlu1 %v2257_v18, %s2170_s25 }
 0x159   :  { %v2261_v19 = vpop.permute.xlu1 %119  ;;  %v2263_v20 = vpop.permute.xlu0 %117 }
 0x15a   :  { %502 = vrot.lane.b32.xlu1 %v2255_v17, %s2170_s25  ;;  %578 = vrot.lane.b32.xlu0 %v2263_v20, %s2170_s25 }
 0x15d   :  { %v199_v21 = vpop.permute.xlu1 %198  ;;  %v122_v22 = vpop.permute.xlu0 %121 }
 0x15e   :  { %1956 = vmatpush3.xpose.msk.msra.mxu1 %vm123_vm2, %v199_v21  ;;  %654 = vrot.lane.b32.xlu1 %v2261_v19, %s2170_s25  ;;  %v815_v21 = vrot.slane %v785_v60, %v2229_v6 }
 0x15f   :  { %1951 = vmatpush3.xpose.msk.msra.mxu0 %vm123_vm2, %v122_v22  ;;  %1960 = vmatprep.subr.mxu1 %v2165_v1 }
 0x160   :  { %1965 = vmatprep.subr.mxu0 %v2165_v1 }
 0x161   :  { %1958 = vmatmul.mubr.msk.f32.vlgmr.msra.gmra.mrb[0].mxu1 %vm123_vm2, %v2242_v14 }
 0x162   :  { %1953 = vmatmul.mubr.msk.f32.vlgmr.msra.gmra.mrb[4].mxu0 %vm123_vm2, %v2238_v10  ;;  %1962 = vmatprep.mubr.msk.f32.mxu1 %vm2166_vm0, %v2165_v1 }
 0x163   :  { %1967 = vmatprep.mubr.msk.f32.mxu0 %vm2166_vm0, %v2165_v1 }
 0x1c4   :  { %v275_v23 = vpop.permute.xlu0 %274 }
 0x1c5   :  { %1961 = vmatpush3.xpose.msk.msra.mxu1 %vm123_vm2, %v275_v23 }
 0x1c6   :  { %1970 = vmatprep.subr.mxu1 %v2165_v1 }
 0x1c8   :  { %v351_v24 = vpop.permute.xlu1 %350  ;;  %1963 = vmatmul.mubr.msk.f32.vlgmr.msra.gmra.mrb[2].mxu1 %vm123_vm2, %v2252_v16  ;;  %v427_v25 = vpop.permute.xlu0 %426 }
 0x1c9   :  { %1966 = vmatpush3.xpose.msk.msra.mxu0 %vm123_vm2, %v351_v24  ;;  %1971 = vmatpush3.xpose.msk.msra.mxu1 %vm123_vm2, %v427_v25  ;;  %v811_v24 = vrot.slane %v783_v0, %v2229_v6  ;;  %v787_v25 = vcombine.high %v783_v0, %v783_v0 }
 0x1ca   :  { %1972 = vmatprep.mubr.msk.f32.mxu1 %vm2166_vm0, %v2165_v1  ;;  %1975 = vmatprep.subr.mxu0 %v2165_v1 }
 0x1cb   :  { %1980 = vmatprep.subr.mxu1 %v2165_v1  ;;  %v819_v36 = vrot.slane %v787_v25, %v2229_v6 }
 0x1cc   :  { %v503_v26 = vpop.permute.xlu1 %502  ;;  %1968 = vmatmul.mubr.msk.f32.vlgmr.msra.gmra.mrb[6].mxu0 %vm123_vm2, %v2257_v18  ;;  %1973 = vmatmul.mubr.msk.f32.vlgmr.msra.gmra.mrb[4].mxu1 %vm123_vm2, %v2250_v15  ;;  %v579_v27 = vpop.permute.xlu0 %578 }
 0x1cd   :  { %1976 = vmatpush3.xpose.msk.msra.mxu0 %vm123_vm2, %v503_v26  ;;  %1981 = vmatpush3.xpose.msk.msra.mxu1 %vm123_vm2, %v579_v27 }
 0x1ce   :  { %1977 = vmatprep.mubr.msk.f32.mxu0 %vm2166_vm0, %v2165_v1  ;;  %1982 = vmatprep.mubr.msk.f32.mxu1 %vm2166_vm0, %v2165_v1 }
 0x1cf   :  { %1985 = vmatprep.subr.mxu0 %v2165_v1  ;;  %1990 = vmatprep.subr.mxu1 %v2165_v1 }
 0x1d0   :  { %v655_v28 = vpop.permute.xlu1 %654  ;;  %1978 = vmatmul.mubr.msk.f32.vlgmr.msra.gmra.mrb[8].mxu0 %vm123_vm2, %v2255_v17  ;;  %1983 = vmatmul.mubr.msk.f32.vlgmr.msra.gmra.mrb[6].mxu1 %vm123_vm2, %v2263_v20 }
 0x1d1   :  { %1986 = vmatpush3.xpose.msk.msra.mxu0 %vm123_vm2, %v655_v28  ;;  %1987 = vmatprep.mubr.msk.f32.mxu0 %vm2166_vm0, %v2165_v1 }
 0x1d2   :  { %1995 = vmatprep.subr.mxu0 %v2165_v1  ;;  %1992 = vmatprep.mubr.msk.f32.mxu1 %vm2166_vm0, %v2165_v1 }
 0x1d4   :  { %1988 = vmatmul.mubr.msk.f32.vlgmr.msra.gmra.mrb[10].mxu0 %vm123_vm2, %v2261_v19 }
 0x1d5   :  { %1997 = vmatprep.mubr.msk.f32.mxu0 %vm2166_vm0, %v2165_v1 }
 0x234   :  { %v270_v39 = vpop.f32.mrb[0].mxu1 }
 0x235   :  { %v194_v41 = vpop.f32.mrb[4].mxu0  ;;  %v731_v42 = vmul.f32 0.35355338, %v270_v39  ;;  %v1959_v43 = vpop.f32.mrb[1].mxu1 }
 0x236   :  { %v730_v44 = vmul.f32 0.35355338, %v194_v41  ;;  %v1954_v45 = vpop.f32.mrb[5].mxu0 }
 0x237   :  { %v2322_v46 = vadd.f32 %v795_v38, %v731_v42 }
 0x238   :  { %v2324_v47 = vadd.f32 %v791_v40, %v730_v44 }
 0x239   :  { %v839_v48 = vsel %vm123_vm2, %v2322_v46, -inf }
 0x23a   :  { %840 = vmax.xlane.f32.xlu1 %v839_v48  ;;  %v836_v49 = vsel %vm123_vm2, %v2324_v47, -inf }
 0x23b   :  { %837 = vmax.xlane.f32.xlu0 %v836_v49 }
 0x29b   :  { %v346_v57 = vpop.f32.mrb[2].mxu1 }
 0x29c   :  { %v732_v58 = vmul.f32 0.35355338, %v346_v57  ;;  %v1964_v59 = vpop.f32.mrb[3].mxu1 }
 0x29e   :  { %v2331_v61 = vadd.f32 %v799_v53, %v732_v58 }
 0x29f   :  { %v422_v2 = vpop.f32.mrb[6].mxu0  ;;  %v498_v4 = vpop.f32.mrb[4].mxu1 }
 0x2a0   :  { %v733_v8 = vmul.f32 0.35355338, %v422_v2  ;;  %v734_v9 = vmul.f32 0.35355338, %v498_v4  ;;  %v1969_v11 = vpop.f32.mrb[7].mxu0  ;;  %v1974_v12 = vpop.f32.mrb[5].mxu1 }
 0x2a1   :  { %v842_v13 = vsel %vm123_vm2, %v2331_v61, -inf }
 0x2a2   :  { %843 = vmax.xlane.f32.xlu0 %v842_v13  ;;  %v832_v22 = vadd.f32 %v807_v62, %v734_v9  ;;  %v831_v23 = vadd.f32 %v803_v63, %v733_v8 }
 0x2a3   :  { %v574_v26 = vpop.f32.mrb[8].mxu0  ;;  %v650_v27 = vpop.f32.mrb[6].mxu1 }
 0x2a4   :  { %v735_v28 = vmul.f32 0.35355338, %v574_v26  ;;  %v736_v29 = vmul.f32 0.35355338, %v650_v27  ;;  %v1979_v30 = vpop.f32.mrb[9].mxu0  ;;  %v1984_v31 = vpop.f32.mrb[7].mxu1 }
 0x2a5   :  { %v848_v32 = vsel %vm123_vm2, %v832_v22, -inf  ;;  %v845_v33 = vsel %vm123_vm2, %v831_v23, -inf }
 0x2a6   :  { %849 = vmax.xlane.f32.xlu1 %v848_v32  ;;  %846 = vmax.xlane.f32.xlu0 %v845_v33  ;;  %v834_v34 = vadd.f32 %v815_v21, %v736_v29  ;;  %v833_v35 = vadd.f32 %v811_v24, %v735_v28 }
 0x2a7   :  { %v726_v37 = vpop.f32.mrb[10].mxu0 }
 0x2a8   :  { %v737_v38 = vmul.f32 0.35355338, %v726_v37  ;;  %v1989_v39 = vpop.f32.mrb[11].mxu0  ;;  %v854_v40 = vsel %vm123_vm2, %v834_v34, -inf  ;;  %v851_v41 = vsel %vm123_vm2, %v833_v35, -inf }
 0x2aa   :  { %855 = vmax.xlane.f32.xlu1 %v854_v40  ;;  %852 = vmax.xlane.f32.xlu0 %v851_v41  ;;  %v835_v42 = vadd.f32 %v819_v36, %v737_v38 }
 0x2ac   :  { %v857_v43 = vsel %vm123_vm2, %v835_v42, -inf }
 0x2ae   :  { %858 = vmax.xlane.f32.xlu0 %v857_v43 }
 0x2bb   :  { %924 = vrot.lane.b32.xlu1 %v2238_v10, %s2172_s3 }
 0x2bf   :  { %1076 = vrot.lane.b32.xlu1 %v2252_v16, %s2172_s3 }
 0x2c3   :  { %1152 = vrot.lane.b32.xlu1 %v2257_v18, %s2172_s3 }
 0x2c4   :  { %1000 = vrot.lane.b32.xlu0 %v2242_v14, %s2172_s3 }
 0x2c7   :  { %1304 = vrot.lane.b32.xlu1 %v2255_v17, %s2172_s3  ;;  %v841_v6 = vpop.xlane.xlu1 %840 }
 0x2c8   :  { %1228 = vrot.lane.b32.xlu0 %v2250_v15, %s2172_s3  ;;  %v861_v44 = vsub.f32 %v2322_v46, %v841_v6  ;;  %v838_v45 = vpop.xlane.xlu0 %837 }
 0x2c9   :  { %v860_v48 = vsub.f32 %v2324_v47, %v838_v45 }
 0x2ca   :  { %v870_v10 = vmul.f32 1.442695, %v861_v44 }
 0x2cb   :  { %v868_v16 = vmul.f32 1.442695, %v860_v48 }
 0x2cc   :  { %2101 = vpow2.f32 %v870_v10 }
 0x2cd   :  { %2103 = vpow2.f32 %v868_v16 }
 0x2d6   :  { %v2359_v18 = vpop.eup %2101 }
 0x2d7   :  { %v887_v14 = vsel %vm123_vm2, %v2359_v18, 0.0  ;;  %v2363_v49 = vpop.eup %2103 }
 0x2d8   :  { %v884_v15 = vsel %vm123_vm2, %v2363_v49, 0.0 }
 0x2e7   :  { %888 = vadd.xlane.f32.xlu0 %v887_v14 }
 0x2eb   :  { %885 = vadd.xlane.f32.xlu1 %v884_v15 }
 0x32f   :  { %v844_v17 = vpop.xlane.xlu0 %843 }
 0x330   :  { %v862_v46 = vsub.f32 %v2331_v61, %v844_v17  ;;  %v2091_v17 = vld [vmem:[%s2493_s1 + $0x1c] ss:$12 sps:$4 sm:$0xff]  }
 0x332   :  { %v872_v50 = vmul.f32 1.442695, %v862_v46 }
 0x333   :  { %v850_v47 = vpop.xlane.xlu1 %849  ;;  %v847_v51 = vpop.xlane.xlu0 %846 }
 0x334   :  { %2105 = vpow2.f32 %v872_v50  ;;  %v864_v52 = vsub.f32 %v832_v22, %v850_v47  ;;  %v863_v53 = vsub.f32 %v831_v23, %v847_v51 }
 0x336   :  { %v876_v54 = vmul.f32 1.442695, %v864_v52  ;;  %v874_v55 = vmul.f32 1.442695, %v863_v53 }
 0x337   :  { %v856_v56 = vpop.xlane.xlu1 %855  ;;  %v853_v57 = vpop.xlane.xlu0 %852 }
 0x338   :  { %2107 = vpow2.f32 %v876_v54  ;;  %v866_v58 = vsub.f32 %v834_v34, %v856_v56  ;;  %v865_v59 = vsub.f32 %v833_v35, %v853_v57 }
 0x339   :  { %2109 = vpow2.f32 %v874_v55 }
 0x33a   :  { %v880_v60 = vmul.f32 1.442695, %v866_v58  ;;  %v878_v62 = vmul.f32 1.442695, %v865_v59 }
 0x33b   :  { %v925_v63 = vpop.permute.xlu1 %924  ;;  %v859_v0 = vpop.xlane.xlu0 %858 }
 0x33c   :  { %2111 = vpow2.f32 %v880_v60  ;;  %v867_v61 = vsub.f32 %v835_v42, %v859_v0  ;;  %1991 = vmatpush3.msra.mxu1 %v925_v63 }
 0x33d   :  { %2113 = vpow2.f32 %v878_v62  ;;  %2000 = vmatprep.subr.mxu1 %v2165_v1 }
 0x33e   :  { %v2106_v2 = vpop.eup %2105  ;;  %v882_v4 = vmul.f32 1.442695, %v867_v61 }
 0x33f   :  { %v1001_v8 = vpop.permute.xlu0 %1000  ;;  %v890_v9 = vsel %vm123_vm2, %v2106_v2, 0.0  ;;  %v1077_v28 = vpop.permute.xlu1 %1076 }
 0x340   :  { %2115 = vpow2.f32 %v882_v4  ;;  %891 = vadd.xlane.f32.xlu1 %v890_v9  ;;  %1996 = vmatpush3.msra.mxu0 %v1001_v8 }
 0x341   :  { %2005 = vmatprep.subr.mxu0 %v2165_v1 }
 0x342   :  { %v2108_v11 = vpop.eup %2107 }
 0x343   :  { %v2110_v12 = vpop.eup %2109  ;;  %v896_v13 = vsel %vm123_vm2, %v2108_v11, 0.0  ;;  %v1153_v29 = vpop.permute.xlu1 %1152 }
 0x344   :  { %897 = vadd.xlane.f32.xlu1 %v896_v13  ;;  %v893_v21 = vsel %vm123_vm2, %v2110_v12, 0.0  ;;  %v1229_v30 = vpop.permute.xlu0 %1228 }
 0x345   :  { %894 = vadd.xlane.f32.xlu0 %v893_v21 }
 0x346   :  { %v2112_v22 = vpop.eup %2111 }
 0x347   :  { %v2114_v23 = vpop.eup %2113  ;;  %v902_v24 = vsel %vm123_vm2, %v2112_v22, 0.0  ;;  %v1305_v31 = vpop.permute.xlu1 %1304 }
 0x348   :  { %903 = vadd.xlane.f32.xlu1 %v902_v24  ;;  %v899_v25 = vsel %vm123_vm2, %v2114_v23, 0.0 }
 0x349   :  { %900 = vadd.xlane.f32.xlu0 %v899_v25 }
 0x34a   :  { %v2375_v26 = vpop.eup %2115 }
 0x34b   :  { %v905_v27 = vsel %vm123_vm2, %v2375_v26, 0.0 }
 0x34d   :  { %906 = vadd.xlane.f32.xlu0 %v905_v27 }
 0x359   :  { %1456 = vrot.lane.b32.xlu1 %v2261_v19, %s2172_s3 }
 0x363   :  { %1380 = vrot.lane.b32.xlu0 %v2263_v20, %s2172_s3 }
 0x374   :  { %v889_v32 = vpop.xlane.xlu0 %888 }
 0x375   :  { %2117 = vrcp.f32 %v889_v32 }
 0x378   :  { %v886_v33 = vpop.xlane.xlu1 %885 }
 0x379   :  { %2119 = vrcp.f32 %v886_v33 }
 0x37f   :  { %v2118_v34 = vpop.eup %2117 }
 0x380   :  { %v917_v35 = vmul.f32 %v2118_v34, %v2359_v18  ;;  %v2088_v18 = vld [vmem:[%s2493_s1 + $0x4] ss:$12 sps:$4 sm:$0xff]  }
 0x382   :  { %1998 = vmatmul.mubr.msk.f32.vlgmr.msra.gmra.mrb[12].mxu0 %vm123_vm2, %v917_v35  ;;  %v1567_v35 = vsub.s32 1, %v2226_v5 }
 0x383   :  { %v2120_v36 = vpop.eup %2119  ;;  %2006 = vmatpush3.msra.mxu0 %v1153_v29  ;;  %2007 = vmatprep.mubr.msk.f32.mxu0 %vm2166_vm0, %v2165_v1 }
 0x384   :  { %v916_v19 = vmul.f32 %v2120_v36, %v2363_v49  ;;  %2015 = vmatprep.subr.mxu0 %v2165_v1  ;;  %v1568_v36 = vrot.slane %v2234_v7, %v1567_v35 }
 0x386   :  { %1993 = vmatmul.mubr.msk.f32.vlgmr.msra.gmra.mrb[8].mxu1 %vm123_vm2, %v916_v19  ;;  %v21_v19 = vunpack.c.l.bf16 %v2215_v3 }
 0x387   :  { %2001 = vmatpush3.msra.mxu1 %v1077_v28  ;;  %2002 = vmatprep.mubr.msk.f32.mxu1 %vm2166_vm0, %v2165_v1 }
 0x388   :  { %2010 = vmatprep.subr.mxu1 %v2165_v1 }
 0x3cd   :  { %v892_v20 = vpop.xlane.xlu1 %891 }
 0x3ce   :  { %2121 = vrcp.f32 %v892_v20 }
 0x3d1   :  { %v898_v37 = vpop.xlane.xlu1 %897 }
 0x3d2   :  { %2123 = vrcp.f32 %v898_v37  ;;  %v895_v38 = vpop.xlane.xlu0 %894 }
 0x3d3   :  { %2125 = vrcp.f32 %v895_v38 }
 0x3d5   :  { %v904_v39 = vpop.xlane.xlu1 %903 }
 0x3d6   :  { %2127 = vrcp.f32 %v904_v39  ;;  %v901_v40 = vpop.xlane.xlu0 %900  ;;  %v22_v39 = vunpack.c.h.bf16 %v2215_v3 }
 0x3d7   :  { %2129 = vrcp.f32 %v901_v40 }
 0x3d8   :  { %v2122_v41 = vpop.eup %2121 }
 0x3d9   :  { %v918_v42 = vmul.f32 %v2122_v41, %v2106_v2  ;;  %v1457_v46 = vpop.permute.xlu1 %1456 }
 0x3da   :  { %v907_v43 = vpop.xlane.xlu0 %906 }
 0x3db   :  { %2131 = vrcp.f32 %v907_v43  ;;  %2003 = vmatmul.mubr.msk.f32.vlgmr.msra.gmra.mrb[10].mxu1 %vm123_vm2, %v918_v42 }
 0x3dc   :  { %v2124_v6 = vpop.eup %2123  ;;  %2011 = vmatpush3.msra.mxu1 %v1229_v30  ;;  %2012 = vmatprep.mubr.msk.f32.mxu1 %vm2166_vm0, %v2165_v1 }
 0x3dd   :  { %v2126_v44 = vpop.eup %2125  ;;  %v920_v45 = vmul.f32 %v2124_v6, %v2108_v11  ;;  %2020 = vmatprep.subr.mxu1 %v2165_v1 }
 0x3de   :  { %v919_v10 = vmul.f32 %v2126_v44, %v2110_v12  ;;  %v1381_v48 = vpop.permute.xlu0 %1380 }
 0x3df   :  { %2013 = vmatmul.mubr.msk.f32.vlgmr.msra.gmra.mrb[12].mxu1 %vm123_vm2, %v920_v45 }
 0x3e0   :  { %v2128_v16 = vpop.eup %2127  ;;  %2008 = vmatmul.mubr.msk.f32.vlgmr.msra.gmra.mrb[14].mxu0 %vm123_vm2, %v919_v10  ;;  %2021 = vmatpush3.msra.mxu1 %v1381_v48 }
 0x3e1   :  { %v2130_v14 = vpop.eup %2129  ;;  %v922_v49 = vmul.f32 %v2128_v16, %v2112_v22  ;;  %2016 = vmatpush3.msra.mxu0 %v1305_v31  ;;  %2017 = vmatprep.mubr.msk.f32.mxu0 %vm2166_vm0, %v2165_v1 }
 0x3e2   :  { %v921_v15 = vmul.f32 %v2130_v14, %v2114_v23  ;;  %2022 = vmatprep.mubr.msk.f32.mxu1 %vm2166_vm0, %v2165_v1  ;;  %2025 = vmatprep.subr.mxu0 %v2165_v1 }
 0x3e3   :  { %2023 = vmatmul.mubr.msk.f32.vlgmr.msra.gmra.mrb[14].mxu1 %vm123_vm2, %v922_v49  ;;  %2030 = vmatprep.subr.bf16.mxu1 %v2165_v1 }
 0x3e4   :  { %2018 = vmatmul.mubr.msk.f32.vlgmr.msra.gmra.mrb[16].mxu0 %vm123_vm2, %v921_v15  ;;  %2031 = vmatpush3.bf16.msra.mxu1 %v2088_v18 }
 0x3e5   :  { %v2132_v50 = vpop.eup %2131  ;;  %2026 = vmatpush3.msra.mxu0 %v1457_v46  ;;  %2027 = vmatprep.mubr.msk.f32.mxu0 %vm2166_vm0, %v2165_v1 }
 0x3e6   :  { %v923_v47 = vmul.f32 %v2132_v50, %v2375_v26  ;;  %2032 = vmatprep.subr.bf16.mxu1 %v2165_v1  ;;  %2034 = vmatprep.mubr.msk.bf16.mxu1 %vm2166_vm0, %v2165_v1  ;;  %v2094_v50 = vld [vmem:[%s2493_s1 + $0x8] ss:$12 sps:$4 sm:$0xff]  }
 0x3e7   :  { %2038 = vmatprep.subr.bf16.mxu0 %v2165_v1 }
 0x3e8   :  { %2028 = vmatmul.mubr.msk.f32.vlgmr.msra.gmra.mrb[18].mxu0 %vm123_vm2, %v923_v47  ;;  %2033 = vmatpush3.bf16.msra.mxu1 %v2091_v17  ;;  %v2095_v47 = vld [vmem:[%s2493_s1 + $0x20] ss:$12 sps:$4 sm:$0xff]  }
 0x3e9   :  { %2042 = vmatprep.mubr.msk.bf16.mxu0 %vm2166_vm0, %v2165_v1  ;;  %2046 = vmatprep.subr.bf16.mxu1 %v2165_v1 }
 0x3ea   :  { %2039 = vmatpush3.bf16.msra.mxu0 %v2094_v50 }
 0x3eb   :  { %2040 = vmatprep.subr.bf16.mxu0 %v2165_v1 }
 0x3ee   :  { %2041 = vmatpush3.bf16.msra.mxu0 %v2095_v47 }
 0x455   :  { %v1072_v51 = vpop.f32.mrb[12].mxu0 }
 0x456   :  { %v1999_v52 = vpop.f32.mrb[13].mxu0 }
 0x457   :  { %v2097_v52 = vld [vmem:[%s2494_s2 + $0x8] sm:$0xff]  }
 0x459   :  { %v996_v53 = vpop.f32.mrb[8].mxu1 }
 0x45a   :  { %v1994_v54 = vpop.f32.mrb[9].mxu1 }
 0x4ae   :  { %v1148_v55 = vpop.f32.mrb[10].mxu1 }
 0x4af   :  { %v2004_v56 = vpop.f32.mrb[11].mxu1 }
 0x4b2   :  { %v1300_v57 = vpop.f32.mrb[12].mxu1 }
 0x4b3   :  { %v1224_v58 = vpop.f32.mrb[14].mxu0  ;;  %v2014_v59 = vpop.f32.mrb[13].mxu1 }
 0x4b4   :  { %v2071_v60 = vpack.i.bf16 %v1224_v58, %v1148_v55  ;;  %v2009_v62 = vpop.f32.mrb[15].mxu0  ;;  %v1652_v59 = vsub.s32 4, %v2226_v5 }
 0x4b5   :  { %v1658_v62 = vsub.s32 5, %v2226_v5 }
 0x4b6   :  { %2072 = vrot.lane.b32.xlu0 %v2071_v60, %s2173_s6  ;;  %v1452_v63 = vpop.f32.mrb[14].mxu1  ;;  %v1653_v60 = vrot.slane %v2234_v7, %v1652_v59 }
 0x4b7   :  { %v1376_v0 = vpop.f32.mrb[16].mxu0  ;;  %v2024_v61 = vpop.f32.mrb[15].mxu1 }
 0x4b8   :  { %v2076_v2 = vpack.i.bf16 %v1376_v0, %v1300_v57  ;;  %v2019_v4 = vpop.f32.mrb[17].mxu0 }
 0x4ba   :  { %2077 = vrot.lane.b32.xlu1 %v2076_v2, %s2174_s7 }
 0x4bb   :  { %v1528_v8 = vpop.f32.mrb[18].mxu0 }
 0x4bc   :  { %v2081_v9 = vpack.i.bf16 %v1528_v8, %v1452_v63  ;;  %v2029_v11 = vpop.f32.mrb[19].mxu0  ;;  %v1659_v8 = vrot.slane %v2234_v7, %v1658_v62 }
 0x4be   :  { %2082 = vrot.lane.b32.xlu0 %v2081_v9, %s2175_s8 }
 0x528   :  { %v2073_v12 = vpop.permute.xlu0 %2072 }
 0x529   :  { %v2075_v21 = vunpack.i.h.bf16 %v2073_v12  ;;  %v2074_v22 = vunpack.i.l.bf16 %v2073_v12 }
 0x52b   :  { %v1557_v26 = vsel %vm123_vm2, %v1072_v51, %v2075_v21  ;;  %v1556_v27 = vsel %vm123_vm2, %v996_v53, %v2074_v22  ;;  %v2096_v51 = vld [vmem:[%s2494_s2] sm:$0xff]   ;;  %v2098_v21 = vld [vmem:[%s2494_s2 + $0x10] sm:$0xff]   ;;  %v2099_v22 = vld [vmem:[%s2494_s2 + $0x18] sm:$0xff]   ;;  %s2176_s2 = smov [#allocation2]  }
 0x52c   :  { %v2078_v13 = vpop.permute.xlu1 %2077  ;;  %s1846_s20 = sshll.u32 %s2176_s2, 4  ;;  %s1847_s20 = int_to_ptr.vmem [resolvable:$true] %s1846_s20 }
 0x52d   :  { %v2080_v23 = vunpack.i.h.bf16 %v2078_v13  ;;  %v2079_v24 = vunpack.i.l.bf16 %v2078_v13  ;;  %s2141_s0 = scalar_lea.vmem %s1847_s20, 256  ;;  %p2146_p1 = scmp.lt.s32.totalorder %s1847_s20, %s1847_s20 }
 0x52e   :  { %p2142_p0 = scmp.ne.s32.totalorder %s1847_s20, %s2141_s0  ;;  %p2147_p2 = scmp.lt.s32.totalorder %s2141_s0, %s2141_s0 }
 0x52f   :  { %v1560_v30 = vsel %vm1558_vm3, %v1557_v26, %v2080_v23  ;;  %v1559_v31 = vsel %vm1558_vm3, %v1556_v27, %v2079_v24  ;;  %v1665_v23 = vsub.s32 2, %v2226_v5 }
 0x530   :  { %v2083_v25 = vpop.permute.xlu0 %2082  ;;  %p2148_p3 = por %p2147_p2, %p2146_p1 }
 0x531   :  { %v2085_v28 = vunpack.i.h.bf16 %v2083_v25  ;;  %v2084_v29 = vunpack.i.l.bf16 %v2083_v25  ;;  %v1666_v24 = vrot.slane %v2234_v7, %v1665_v23 }
 0x532   :  { %p2149_p4 = pnand %p2148_p3, %p2142_p0 }
 0x533   :  { %v1563_v32 = vsel %vm1561_vm4, %v1560_v30, %v2085_v28  ;;  %v1562_v33 = vsel %vm1561_vm4, %v1559_v31, %v2084_v29 }
 0x534   :  { %v1564_v34 = vpack.c.bf16 %v1563_v32, %v1562_v33 }
 0x536   :  { %2035 = vmatmul.mubr.msk.bf16.vlgmr.msra.gmra.mrb[16].mxu1 %vm62_vm1, %v1564_v34 }
 0x537   :  { %2054 = vmatprep.mubr.msk.bf16.mxu1 %vm2166_vm0, %v2165_v1  ;;  %2047 = vmatpush3.bf16.msra.mxu1 %v2096_v51  ;;  %v1829_v51 = vsub.s32 6, %v2226_v5 }
 0x538   :  { %2048 = vmatprep.subr.bf16.mxu1 %v2165_v1 }
 0x53b   :  { %2049 = vmatpush3.bf16.msra.mxu1 %v2097_v52  ;;  %v1835_v52 = vsub.s32 7, %v2226_v5 }
 0x53c   :  { %2050 = vmatprep.subr.bf16.mxu1 %v2165_v1 }
 0x53f   :  { %2051 = vmatpush3.bf16.msra.mxu1 %v2098_v21 }
 0x540   :  { %2052 = vmatprep.subr.bf16.mxu1 %v2165_v1  ;;  %v1728_v1 = vsub.s32 3, %v2226_v5 }
 0x542   :  { %v1729_v34 = vrot.slane %v2234_v7, %v1728_v1 }
 0x543   :  { %2053 = vmatpush3.bf16.msra.mxu1 %v2099_v22 }
 0x609   :  { %v1614_v20 = vpop.f32.mrb[16].mxu1 }
 0x60a   :  { %v1615_v37 = vadd.f32 %v1614_v20, %v1568_v36  ;;  %v2036_v38 = vpop.f32.mrb[17].mxu1 }
 0x60b   :  { %v1617_v40 = vpop.f32.mrb[18].mxu1 }
 0x60c   :  { %v1618_v41 = vadd.f32 %v1617_v40, %v1568_v36  ;;  %v2037_v42 = vpop.f32.mrb[19].mxu1  ;;  %v1621_v43 = vadd.f32 %v1615_v37, %v21_v19 }
 0x60e   :  { %v1623_v6 = vsel %vm62_vm1, %v1621_v43, 0.0  ;;  %v1622_v44 = vadd.f32 %v1618_v41, %v22_v39 }
 0x60f   :  { %1624 = vadd.xlane.f32.xlu1 %v1623_v6 }
 0x610   :  { %v1626_v45 = vsel %vm62_vm1, %v1622_v44, 0.0 }
 0x611   :  { %1627 = vadd.xlane.f32.xlu0 %v1626_v45 }
 0x69c   :  { %v1625_v10 = vpop.xlane.xlu1 %1624 }
 0x69d   :  { %v1630_v48 = vmul.f32 0.03125, %v1625_v10 }
 0x69e   :  { %v1628_v16 = vpop.xlane.xlu0 %1627 }
 0x69f   :  { %v1632_v18 = vsub.f32 %v1621_v43, %v1630_v48  ;;  %v1631_v14 = vmul.f32 0.03125, %v1628_v16 }
 0x6a1   :  { %v1633_v49 = vsub.f32 %v1622_v44, %v1631_v14  ;;  %v1634_v15 = vmul.f32 %v1632_v18, %v1632_v18 }
 0x6a3   :  { %v1636_v3 = vsel %vm62_vm1, %v1634_v15, 0.0  ;;  %v1635_v17 = vmul.f32 %v1633_v49, %v1633_v49 }
 0x6a4   :  { %1637 = vadd.xlane.f32.xlu0 %v1636_v3 }
 0x6a5   :  { %v1639_v46 = vsel %vm62_vm1, %v1635_v17, 0.0 }
 0x6a6   :  { %1640 = vadd.xlane.f32.xlu1 %v1639_v46 }
 0x731   :  { %v1638_v53 = vpop.xlane.xlu0 %1637 }
 0x732   :  { %v1642_v54 = vmul.f32 0.03125, %v1638_v53  ;;  %v1830_v53 = vrot.slane %v2234_v7, %v1829_v51 }
 0x733   :  { %v1641_v55 = vpop.xlane.xlu1 %1640 }
 0x734   :  { %v1644_v56 = vadd.f32 1e-05, %v1642_v54  ;;  %v1643_v57 = vmul.f32 0.03125, %v1641_v55 }
 0x736   :  { %2133 = vrsqrt.f32 %v1644_v56  ;;  %v1645_v58 = vadd.f32 1e-05, %v1643_v57  ;;  %v1836_v56 = vrot.slane %v2234_v7, %v1835_v52 }
 0x738   :  { %2135 = vrsqrt.f32 %v1645_v58 }
 0x740   :  { %v2134_v63 = vpop.eup %2133 }
 0x741   :  { %v1648_v0 = vmul.f32 %v2134_v63, %v1632_v18 }
 0x742   :  { %v2136_v61 = vpop.eup %2135 }
 0x743   :  { %v1654_v2 = vmul.f32 %v1653_v60, %v1648_v0  ;;  %v1649_v4 = vmul.f32 %v2136_v61, %v1633_v49 }
 0x745   :  { %v1655_v9 = vmul.f32 %v1653_v60, %v1649_v4  ;;  %v1660_v11 = vadd.f32 %v1659_v8, %v1654_v2 }
 0x747   :  { %v1661_v12 = vadd.f32 %v1659_v8, %v1655_v9 }
 0x749   :  { %v1662_v13 = vpack.c.bf16 %v1661_v12, %v1660_v11 }
 0x74b   :  { %2043 = vmatmul.mubr.msk.bf16.vlgmr.msra.gmra.mrb[20].mxu0 %vm62_vm1, %v1662_v13 }
 0x81e   :  { %v1716_v25 = vpop.f32.mrb[20].mxu0 }
 0x81f   :  { %v1717_v26 = vadd.f32 %v1716_v25, %v1666_v24  ;;  %v2044_v27 = vpop.f32.mrb[21].mxu0 }
 0x820   :  { %v1719_v28 = vpop.f32.mrb[22].mxu0 }
 0x821   :  { %v1720_v29 = vadd.f32 %v1719_v28, %v1666_v24  ;;  %v2045_v30 = vpop.f32.mrb[23].mxu0  ;;  %v1723_v31 = vmax.f32 %v1717_v26, 0.0 }
 0x823   :  { %v1724_v32 = vmax.f32 %v1720_v29, 0.0 }
 0x825   :  { %v1725_v33 = vpack.c.bf16 %v1724_v32, %v1723_v31 }
 0x827   :  { %2055 = vmatmul.mubr.msk.bf16.vlgmr.msra.gmra.mrb[20].mxu1 %vm1754_vm5, %v1725_v33 }
 0x8fa   :  { %v1792_v35 = vpop.f32.mrb[20].mxu1 }
 0x8fb   :  { %v1793_v36 = vadd.f32 %v1792_v35, %v1729_v34  ;;  %v2056_v19 = vpop.f32.mrb[21].mxu1 }
 0x8fc   :  { %v1795_v20 = vpop.f32.mrb[22].mxu1 }
 0x8fd   :  { %v1796_v37 = vadd.f32 %v1795_v20, %v1729_v34  ;;  %v2057_v38 = vpop.f32.mrb[23].mxu1  ;;  %v1799_v39 = vadd.f32 %v1793_v36, %v1660_v11 }
 0x8ff   :  { %v1801_v40 = vsel %vm62_vm1, %v1799_v39, 0.0  ;;  %v1800_v41 = vadd.f32 %v1796_v37, %v1661_v12 }
 0x900   :  { %1802 = vadd.xlane.f32.xlu0 %v1801_v40 }
 0x901   :  { %v1804_v42 = vsel %vm62_vm1, %v1800_v41, 0.0 }
 0x902   :  { %1805 = vadd.xlane.f32.xlu1 %v1804_v42 }
 0x98d   :  { %v1803_v43 = vpop.xlane.xlu0 %1802 }
 0x98e   :  { %v1807_v6 = vmul.f32 0.03125, %v1803_v43 }
 0x98f   :  { %v1806_v44 = vpop.xlane.xlu1 %1805 }
 0x990   :  { %v1809_v45 = vsub.f32 %v1799_v39, %v1807_v6  ;;  %v1808_v10 = vmul.f32 0.03125, %v1806_v44 }
 0x992   :  { %v1810_v48 = vsub.f32 %v1800_v41, %v1808_v10  ;;  %v1811_v16 = vmul.f32 %v1809_v45, %v1809_v45 }
 0x994   :  { %v1813_v18 = vsel %vm62_vm1, %v1811_v16, 0.0  ;;  %v1812_v14 = vmul.f32 %v1810_v48, %v1810_v48 }
 0x995   :  { %1814 = vadd.xlane.f32.xlu0 %v1813_v18 }
 0x996   :  { %v1816_v49 = vsel %vm62_vm1, %v1812_v14, 0.0 }
 0x997   :  { %1817 = vadd.xlane.f32.xlu1 %v1816_v49 }
 0xa22   :  { %v1815_v15 = vpop.xlane.xlu0 %1814 }
 0xa23   :  { %v1819_v3 = vmul.f32 0.03125, %v1815_v15 }
 0xa24   :  { %v1818_v17 = vpop.xlane.xlu1 %1817 }
 0xa25   :  { %v1821_v46 = vadd.f32 1e-05, %v1819_v3  ;;  %v1820_v50 = vmul.f32 0.03125, %v1818_v17 }
 0xa27   :  { %2137 = vrsqrt.f32 %v1821_v46  ;;  %v1822_v47 = vadd.f32 1e-05, %v1820_v50 }
 0xa29   :  { %2139 = vrsqrt.f32 %v1822_v47 }
 0xa31   :  { %v2138_v54 = vpop.eup %2137 }
 0xa32   :  { %v1825_v55 = vmul.f32 %v2138_v54, %v1809_v45 }
 0xa33   :  { %v2140_v57 = vpop.eup %2139 }
 0xa34   :  { %v1826_v58 = vmul.f32 %v2140_v57, %v1810_v48  ;;  %v1831_v59 = vmul.f32 %v1830_v53, %v1825_v55 }
 0xa36   :  { %v1832_v60 = vmul.f32 %v1830_v53, %v1826_v58  ;;  %v1837_v62 = vadd.f32 %v1836_v56, %v1831_v59 }
 0xa38   :  { %v1838_v63 = vadd.f32 %v1836_v56, %v1832_v60  ;;  %1839 = vst.msk [vmem:[#allocation2] sm:$0xff] %vm62_vm1, %v1837_v62 }
 0xa3a   :  { %1840 = vst.msk [vmem:[#allocation2 + $0x8] sm:$0xff] %vm62_vm1, %v1838_v63 }
 0xa3b   :  { %2152 = shalt.err (!%p2149_p4)
}
 0xa3c   :  { %s2153_s23 = scalar_lea.hbm %s2496_s4, 256 }
 0xa3d   :  { %p2154_p5 = scmp.ne.s32.totalorder %s2496_s4, %s2153_s23  ;;  %p2157_p6 = scmp.lt.u32.totalorder %s2153_s23, %s2496_s4 }
 0xa3f   :  { %p2159_p7 = pnand %p2157_p6, %p2154_p5 }
 0xa41   :  { %2162 = shalt.err (!%p2159_p7)
}
 0xa42   :  { %s2177_s3 = smov 128  }
 0xa43   :  { %1852 = dma.vmem_to_hbm [thread:$0]  %s1847_s20, 256, %s2496_s4, [#allocation3], %s2177_s3, %s2177_s3, %s2173_s6  }
 0xa44   :  { %2163 = dma.done.wait [#allocation3], 256  }
 0xa45   :  { %2164 = vsyncadd [#allocation3], 4294967040 }
 0xa46   :  { %1856 = vsyncpa [#allocation3], 1 }

</bundles_post_ra>
